<compile_context>
chip_gen: v5e
topology: v5e:2x2
jax: 0.10.0
libtpu: 0.0.40
codegen_flags: <defaults>
</compile_context>

<pallas_src>
import jax
import jax.numpy as jnp
from jax.experimental import pallas as pl
from jax.experimental.pallas import tpu as pltpu


def _round_up(x, m):
    return (x + m - 1) // m * m


# ----------------------------- Pallas kernel --------------------------------
def critic_mlp_kernel(x_ref, w1_ref, b1_ref, w2_ref, b2_ref, w3_ref, b3_ref,
                      q_ref):
    """One batch tile, batch on lanes: q^T = W3^T relu(W2^T relu(W1^T x^T + b1) + b2) + b3."""
    f32 = jnp.float32

    # fc1: (H, F) @ (F, tm) -> (H, tm).  N = tm is lane-dense.
    h = jnp.dot(w1_ref[...], x_ref[...], preferred_element_type=f32)
    h = jnp.maximum(h + b1_ref[...], 0.0)          # f32 bias + ReLU (v5e-safe)

    # fc2: (H, H) @ (H, tm) -> (H, tm).  Only the MXU operand is downcast.
    h = jnp.dot(w2_ref[...], h.astype(w2_ref.dtype), preferred_element_type=f32)
    h = jnp.maximum(h + b2_ref[...], 0.0)

    # fc3: (Q, H) @ (H, tm) -> (Q, tm).  Output is naturally lane-dense.
    q = jnp.dot(w3_ref[...], h.astype(w3_ref.dtype), preferred_element_type=f32)
    q_ref[...] = (q + b3_ref[...]).astype(q_ref.dtype)


# --------------------------- tiling heuristics --------------------------------
def _default_tiling_params():
    """(tile_m, vmem_limit_bytes) sized per chip generation."""
    vmem_phys = None
    try:
        info = pltpu.get_tpu_info()
        vmem_phys = getattr(info, "vmem_capacity_bytes", None)
    except Exception:
        vmem_phys = None
    if vmem_phys is None:
        vmem_phys = 64 * 1024 * 1024            # conservative (v7x-safe) default
    if vmem_phys >= 96 * 1024 * 1024:           # v5e / v6e: 128 MiB physical VMEM
        return 8192, 64 * 1024 * 1024
    return 4096, 32 * 1024 * 1024               # v7x: 64 MiB physical / 32 MiB scoped


def _choose_tiling(batch, tile_m):
    """Even batch split across grid steps; lane-granule (128) padding only."""
    lane = 128
    b128 = _round_up(max(batch, 1), lane)
    n_steps = max(pl.cdiv(b128, tile_m), 1)
    # Ensure >= 2 grid steps when the batch allows it so v7x's second
    # TensorCore gets work (harmless on single-TC v5e/v6e).
    if n_steps == 1 and b128 >= 2 * lane:
        n_steps = 2
    tm = _round_up(pl.cdiv(b128, n_steps), lane)
    return tm, tm * n_steps, n_steps


# ------------------------------ wrapper --------------------------------------
def facmaddpg_critic_forward(inputs, actions, params, *,
                             compute_dtype=jnp.bfloat16,
                             tile_m=None, vmem_limit_bytes=None):
    """Mirrors FacMADDPGCritic.forward(inputs, actions, hidden_state=None).

    params = (w1, b1, w2, b2, w3, b3); weights stored as (in, out)
    (transpose of PyTorch nn.Linear.weight), biases as (1, out).
    """
    w1, b1, w2, b2, w3, b3 = params
    n_actions = actions.shape[-1]
    obs_dim = w1.shape[0] - n_actions
    feat = obs_dim + n_actions
    hidden = w1.shape[1]
    q_dim = w3.shape[1]

    obs_flat = inputs.reshape(-1, obs_dim)
    act_flat = actions.reshape(-1, n_actions)
    batch = obs_flat.shape[0]

    d_tile, d_vmem = _default_tiling_params()
    tile_m = d_tile if tile_m is None else tile_m
    vmem_limit_bytes = d_vmem if vmem_limit_bytes is None else vmem_limit_bytes
    tm, b_pad, n_steps = _choose_tiling(batch, tile_m)

    # Wrapper-side concat + transpose: x^T has shape (F, B_pad) with batch on
    # the fast (lane) axis, so fc1 is ONE merged matmul and every DMA row is a
    # contiguous tm-wide slab.
    x = jnp.concatenate([obs_flat, act_flat], axis=-1)          # (B, F)
    if b_pad != batch:
        x = jnp.pad(x, ((0, b_pad - batch), (0, 0)))
    x_t = x.T.astype(compute_dtype)                              # (F, B_pad)

    # Weights transposed to (out, in); biases as (out, 1) f32 columns that
    # broadcast across the lane (batch) axis.
    w1t = w1.T.astype(compute_dtype)                             # (H, F)
    w2t = w2.T.astype(compute_dtype)                             # (H, H)
    w3t = w3.T.astype(compute_dtype)                             # (Q, H)
    b1c = b1.reshape(hidden, 1).astype(jnp.float32)
    b2c = b2.reshape(hidden, 1).astype(jnp.float32)
    b3c = b3.reshape(q_dim, 1).astype(jnp.float32)

    def resident(shape):  # same block every grid step -> stays VMEM-resident
        return pl.BlockSpec(shape, lambda i: (0, 0))

    q_t = pl.pallas_call(
        critic_mlp_kernel,
        out_shape=jax.ShapeDtypeStruct((q_dim, b_pad), jnp.float32),
        grid=(n_steps,),
        in_specs=[
            pl.BlockSpec((feat, tm), lambda i: (0, i)),          # x^T batch tile
            resident((hidden, feat)),
            resident((hidden, 1)),
            resident((hidden, hidden)),
            resident((hidden, 1)),
            resident((q_dim, hidden)),
            resident((q_dim, 1)),
        ],
        out_specs=pl.BlockSpec((q_dim, tm), lambda i: (0, i)),   # lane-dense out
        compiler_params=pltpu.CompilerParams(
            dimension_semantics=("parallel",),
            vmem_limit_bytes=vmem_limit_bytes,
        ),
    )(x_t, w1t, b1c, w2t, b2c, w3t, b3c)

    q = q_t.T[:batch]                                            # (B, Q)
    return q, None  # (q, hidden_state)


# --------------------------- parameter construction --------------------------
def init_linear(key, in_dim, out_dim):
    """PyTorch nn.Linear default init: U(-1/sqrt(in), 1/sqrt(in))."""
    kw, kb = jax.random.split(key)
    bound = 1.0 / jnp.sqrt(jnp.float32(in_dim))
    w = jax.random.uniform(kw, (in_dim, out_dim), jnp.float32, -bound, bound)
    b = jax.random.uniform(kb, (1, out_dim), jnp.float32, -bound, bound)
    return w, b


if __name__ == "__main__":
    # Small, module-consistent shapes.
    bs = 2            # batch size
    n_agents = 4
    obs_dim = 11      # scheme['obs']['vshape']
    n_actions = 5
    input_shape = obs_dim + n_actions   # 16
    hidden = 32       # args.rnn_hidden_dim
    q_embed = 1       # getattr(args, 'q_embed_dim', 1)

    key = jax.random.PRNGKey(0)
    k_in, k_act, k1, k2, k3 = jax.random.split(key, 5)

    inputs = jax.random.normal(k_in, (bs, n_agents, obs_dim), jnp.float32)
    actions = jax.random.normal(k_act, (bs, n_agents, n_actions), jnp.float32)

    w1, b1 = init_linear(k1, input_shape, hidden)
    w2, b2 = init_linear(k2, hidden, hidden)
    w3, b3 = init_linear(k3, hidden, q_embed)
    params = (w1, b1, w2, b2, w3, b3)

    # Reference in plain JAX (same math, explicit concat).
    x = jnp.concatenate(
        [inputs.reshape(-1, obs_dim), actions.reshape(-1, n_actions)], axis=-1
    )
    h = jnp.maximum(x @ w1 + b1, 0.0)
    h = jnp.maximum(h @ w2 + b2, 0.0)
    q_ref = h @ w3 + b3

    # 1) Exact-math check in f32.
    q32, _ = facmaddpg_critic_forward(
        inputs, actions, params, compute_dtype=jnp.float32)
    q32 = jax.block_until_ready(q32)
    assert q32.shape == (bs * n_agents, q_embed), q32.shape
    assert jnp.allclose(q32, q_ref, atol=1e-4, rtol=1e-4), float(
        jnp.max(jnp.abs(q32 - q_ref)))

    # 2) Default (bf16 storage / f32 accumulation) path, looser tolerance.
    qbf, hidden_state = facmaddpg_critic_forward(inputs, actions, params)
    qbf = jax.block_until_ready(qbf)
    assert qbf.shape == (bs * n_agents, q_embed), qbf.shape
    assert jnp.allclose(qbf, q_ref, atol=5e-2, rtol=5e-2), float(
        jnp.max(jnp.abs(qbf - q_ref)))

    print("KERNEL_OK")
</pallas_src>

<mosaic_0001>
module attributes {stable_mosaic.version = 11 : i64} {
  func.func @critic_mlp_kernel(%arg0: i32, %arg1: memref<16x128xf32, #tpu.memory_space<vmem>>, %arg2: memref<32x16xf32, #tpu.memory_space<vmem>>, %arg3: memref<32x1xf32, #tpu.memory_space<vmem>>, %arg4: memref<32x32xf32, #tpu.memory_space<vmem>>, %arg5: memref<32x1xf32, #tpu.memory_space<vmem>>, %arg6: memref<1x32xf32, #tpu.memory_space<vmem>>, %arg7: memref<1x1xf32, #tpu.memory_space<vmem>>, %arg8: memref<1x128xf32, #tpu.memory_space<vmem>>) attributes {dimension_semantics = [#tpu.dimension_semantics<parallel>], iteration_bounds = array<i64: 1>, scalar_prefetch = 0 : i64, scratch_operands = 0 : i64, tpu.core_type = #tpu.core_type<tc>, window_params = [{transform_indices = @transform_0, window_bounds = array<i64: 16, 128>}, {pipeline_mode = #tpu.pipeline_mode<synchronous>, transform_indices = @transform_1, window_bounds = array<i64: 32, 16>}, {pipeline_mode = #tpu.pipeline_mode<synchronous>, transform_indices = @transform_2, window_bounds = array<i64: 32, 1>}, {pipeline_mode = #tpu.pipeline_mode<synchronous>, transform_indices = @transform_3, window_bounds = array<i64: 32, 32>}, {pipeline_mode = #tpu.pipeline_mode<synchronous>, transform_indices = @transform_4, window_bounds = array<i64: 32, 1>}, {pipeline_mode = #tpu.pipeline_mode<synchronous>, transform_indices = @transform_5, window_bounds = array<i64: 1, 32>}, {pipeline_mode = #tpu.pipeline_mode<synchronous>, transform_indices = @transform_6, window_bounds = array<i64: 1, 1>}, {transform_indices = @transform_7, window_bounds = array<i64: 1, 128>}]} {
    %c0 = arith.constant 0 : index
    %c0_0 = arith.constant 0 : index
    %0 = vector.load %arg2[%c0, %c0_0] : memref<32x16xf32, #tpu.memory_space<vmem>>, vector<32x16xf32>
    %c0_1 = arith.constant 0 : index
    %c0_2 = arith.constant 0 : index
    %1 = vector.load %arg1[%c0_1, %c0_2] : memref<16x128xf32, #tpu.memory_space<vmem>>, vector<16x128xf32>
    %cst = arith.constant dense<0.000000e+00> : vector<32x128xf32>
    %2 = tpu.matmul %0, %1, %cst {dimension_numbers = #tpu.dot_dimension_numbers<[1], [0], [0], [1], [0, 0, 1, 1], [], []>} : vector<32x16xf32>, vector<16x128xf32>, vector<32x128xf32> -> vector<32x128xf32>
    %c0_3 = arith.constant 0 : index
    %c0_4 = arith.constant 0 : index
    %3 = vector.load %arg3[%c0_3, %c0_4] : memref<32x1xf32, #tpu.memory_space<vmem>>, vector<32x1xf32>
    %4 = vector.broadcast %3 : vector<32x1xf32> to vector<32x128xf32>
    %5 = arith.addf %2, %4 : vector<32x128xf32>
    %cst_5 = arith.constant 0.000000e+00 : f32
    %6 = vector.broadcast %cst_5 : f32 to vector<32x128xf32>
    %7 = arith.maximumf %5, %6 : vector<32x128xf32>
    %c0_6 = arith.constant 0 : index
    %c0_7 = arith.constant 0 : index
    %8 = vector.load %arg4[%c0_6, %c0_7] : memref<32x32xf32, #tpu.memory_space<vmem>>, vector<32x32xf32>
    %cst_8 = arith.constant dense<0.000000e+00> : vector<32x128xf32>
    %9 = tpu.matmul %8, %7, %cst_8 {dimension_numbers = #tpu.dot_dimension_numbers<[1], [0], [0], [1], [0, 0, 1, 1], [], []>} : vector<32x32xf32>, vector<32x128xf32>, vector<32x128xf32> -> vector<32x128xf32>
    %c0_9 = arith.constant 0 : index
    %c0_10 = arith.constant 0 : index
    %10 = vector.load %arg5[%c0_9, %c0_10] : memref<32x1xf32, #tpu.memory_space<vmem>>, vector<32x1xf32>
    %11 = vector.broadcast %10 : vector<32x1xf32> to vector<32x128xf32>
    %12 = arith.addf %9, %11 : vector<32x128xf32>
    %cst_11 = arith.constant 0.000000e+00 : f32
    %13 = vector.broadcast %cst_11 : f32 to vector<32x128xf32>
    %14 = arith.maximumf %12, %13 : vector<32x128xf32>
    %c0_12 = arith.constant 0 : index
    %c0_13 = arith.constant 0 : index
    %15 = vector.load %arg6[%c0_12, %c0_13] : memref<1x32xf32, #tpu.memory_space<vmem>>, vector<1x32xf32>
    %cst_14 = arith.constant dense<0.000000e+00> : vector<1x128xf32>
    %16 = tpu.matmul %15, %14, %cst_14 {dimension_numbers = #tpu.dot_dimension_numbers<[1], [0], [0], [1], [0, 0, 1, 1], [], []>} : vector<1x32xf32>, vector<32x128xf32>, vector<1x128xf32> -> vector<1x128xf32>
    %c0_15 = arith.constant 0 : index
    %c0_16 = arith.constant 0 : index
    %17 = vector.load %arg7[%c0_15, %c0_16] : memref<1x1xf32, #tpu.memory_space<vmem>>, vector<1x1xf32>
    %18 = vector.broadcast %17 : vector<1x1xf32> to vector<1x128xf32>
    %19 = arith.addf %16, %18 : vector<1x128xf32>
    %c0_17 = arith.constant 0 : index
    %c0_18 = arith.constant 0 : index
    %20 = vector.load %arg8[%c0_17, %c0_18] : memref<1x128xf32, #tpu.memory_space<vmem>>, vector<1x128xf32>
    tpu.vector_store %arg8[%c0_17, %c0_18], %19 {strides = array<i32>} : memref<1x128xf32, #tpu.memory_space<vmem>>, vector<1x128xf32>,
    return
  }
  func.func @transform_0(%arg0: i32) -> (i32, i32) {
    %c0_i32 = arith.constant 0 : i32
    %c0_i32_0 = arith.constant 0 : i32
    return %c0_i32, %arg0 : i32, i32
  }
  func.func @transform_1(%arg0: i32) -> (i32, i32) {
    %c0_i32 = arith.constant 0 : i32
    %c0_i32_0 = arith.constant 0 : i32
    %c0_i32_1 = arith.constant 0 : i32
    return %c0_i32, %c0_i32_0 : i32, i32
  }
  func.func @transform_2(%arg0: i32) -> (i32, i32) {
    %c0_i32 = arith.constant 0 : i32
    %c0_i32_0 = arith.constant 0 : i32
    %c0_i32_1 = arith.constant 0 : i32
    return %c0_i32, %c0_i32_0 : i32, i32
  }
  func.func @transform_3(%arg0: i32) -> (i32, i32) {
    %c0_i32 = arith.constant 0 : i32
    %c0_i32_0 = arith.constant 0 : i32
    %c0_i32_1 = arith.constant 0 : i32
    return %c0_i32, %c0_i32_0 : i32, i32
  }
  func.func @transform_4(%arg0: i32) -> (i32, i32) {
    %c0_i32 = arith.constant 0 : i32
    %c0_i32_0 = arith.constant 0 : i32
    %c0_i32_1 = arith.constant 0 : i32
    return %c0_i32, %c0_i32_0 : i32, i32
  }
  func.func @transform_5(%arg0: i32) -> (i32, i32) {
    %c0_i32 = arith.constant 0 : i32
    %c0_i32_0 = arith.constant 0 : i32
    %c0_i32_1 = arith.constant 0 : i32
    return %c0_i32, %c0_i32_0 : i32, i32
  }
  func.func @transform_6(%arg0: i32) -> (i32, i32) {
    %c0_i32 = arith.constant 0 : i32
    %c0_i32_0 = arith.constant 0 : i32
    %c0_i32_1 = arith.constant 0 : i32
    return %c0_i32, %c0_i32_0 : i32, i32
  }
  func.func @transform_7(%arg0: i32) -> (i32, i32) {
    %c0_i32 = arith.constant 0 : i32
    %c0_i32_0 = arith.constant 0 : i32
    return %c0_i32, %arg0 : i32, i32
  }
}

</mosaic_0001>

<bundles_post_ra>
// kernel: tpu_custom_call.1
= control target key start
LH: loop header
LB: loop body
LE: loop exit
PB: predicated region body
PF: predicated region fallthrough
CT: control target
= control target key end

     0   :  { %s391_s0 = inlined_call_operand.vmem [shape: f32[16,128], index: 0, kind: input, shape index: {}]   ;;  %s392_s1 = inlined_call_operand.vmem [shape: f32[32,16], index: 1, kind: input, shape index: {}]   ;;  %s393_s2 = inlined_call_operand.vmem [shape: f32[32,1], index: 2, kind: input, shape index: {}]   ;;  %s394_s3 = inlined_call_operand.vmem [shape: f32[32,32], index: 3, kind: input, shape index: {}]   ;;  %s395_s4 = inlined_call_operand.vmem [shape: f32[32,1], index: 4, kind: input, shape index: {}]   ;;  %s396_s5 = inlined_call_operand.vmem [shape: f32[1,32], index: 5, kind: input, shape index: {}]   ;;  %s397_s6 = inlined_call_operand.<no memory space> [shape: f32[1,1], index: 6, kind: input, shape index: {}]   ;;  %s398_s7 = inlined_call_operand.hbm [shape: f32[1,128], index: 7, kind: output, shape index: {}]  }
   0x1   :  { %v12_v0 = vstv %s397_s6 }
   0x2   :  { %13 = vst [vmem:[#allocation2] sm:$0x1] %v12_v0 }
   0x3   :  { %v34_v1 = vld [vmem:[%s391_s0 + $0x8] sm:$0xff]  ;;  %v33_v2 = vld [vmem:[%s391_s0] sm:$0xff]  ;;  %vm59_vm0 = vcmask 130048   ;;  %v277_v4 = vmov 0   ;;  %v38_v5 = vld [vmem:[%s393_s2 + $0x18] sm:$0xff] }
   0x4   :  { %86 = vmatpush.msra.mxu0 %v34_v1  ;;  %v29_v3 = vld [vmem:[%s392_s1] sm:$0xff]  ;;  %249 = vset.pattern.permute.xlu1 %v277_v4  ;;  %v36_v6 = vld [vmem:[%s393_s2 + $0x8] sm:$0xff]  ;;  %v32_v7 = vld [vmem:[%s392_s1 + $0x18] sm:$0xff] }
   0x5   :  { %248 = vset.pattern.permute.xlu0 %v277_v4  ;;  %46 = vperm.xlu1 %249, %v36_v6  }
   0x6   :  { %87 = vmatpush.msra.mxu0 %v33_v2  ;;  %56 = vperm.xlu0 %248, %v38_v5  }
   0x7   :  { %227 = vmatmul.msk.f32.vlgmr.msra.gmra.mxu0 %vm59_vm0, %v29_v3  ;;  %236 = vmatpush.msra.mxu1 %v34_v1 }
   0x8   :  { %14 = vsyncpa [#allocation4], 0  ;;  %250 = vset.pattern.permute.xlu2 %v277_v4  ;;  %v35_v8 = vld [vmem:[%s393_s2] sm:$0xff]  ;;  %v37_v9 = vld [vmem:[%s393_s2 + $0x10] sm:$0xff]  ;;  %vm133_vm1 = vcmask 261120   ;;  %s278_s11 = smov [#allocation3]  }
   0x9   :  { %237 = vmatpush.msra.mxu1 %v33_v2  ;;  %v30_v10 = vld [vmem:[%s392_s1 + $0x8] sm:$0xff]  ;;  %v109_v11 = vld [vmem:[%s395_s4] sm:$0xff]  ;;  %v31_v13 = vld [vmem:[%s392_s1 + $0x10] sm:$0xff]  ;;  %s216_s0 = sshll.u32 %s278_s11, 4  ;;  %s218_s14 = sshll.u32 %s398_s7, 4  ;;  %s217_s0 = int_to_ptr.vmem [resolvable:$true] %s216_s0  ;;  %s219_s14 = int_to_ptr.hbm [resolvable:$true] %s218_s14 }
   0xa   :  { %230 = vmatmul.msk.f32.vlgmr.msra.gmra.mxu1 %vm59_vm0, %v32_v7  ;;  %v110_v12 = vld [vmem:[%s395_s4 + $0x8] sm:$0xff]  ;;  %v112_v17 = vld [vmem:[%s395_s4 + $0x18] sm:$0xff]  ;;  %v111_v22 = vld [vmem:[%s395_s4 + $0x10] sm:$0xff] }
   0xb   :  { %130 = vperm.xlu2 %250, %v112_v17   ;;  %v180_v28 = vld [vmem:[#allocation2] sm:$0x1]  ;;  %v106_v34 = vld [vmem:[%s394_s3 + $0x8] sm:$0xff]  ;;  %v107_v35 = vld [vmem:[%s394_s3 + $0x10] sm:$0xff] }
   0xc   :  { %v105_v33 = vld [vmem:[%s394_s3] sm:$0xff]  ;;  %v108_v36 = vld [vmem:[%s394_s3 + $0x18] sm:$0xff] }
   0xd   :  { %41 = vperm.xlu1 %249, %v35_v8   ;;  %v179_v53 = vld [vmem:[%s396_s5] sm:$0x1] }
   0xe   :  { %51 = vperm.xlu0 %248, %v37_v9  }
   0xf   :  { %228 = vmatmul.msk.f32.gmra.mxu0 %vm59_vm0, %v30_v10 }
  0x13   :  { %125 = vperm.xlu2 %250, %v111_v22  }
  0x15   :  { %115 = vperm.xlu1 %249, %v109_v11  }
  0x16   :  { %120 = vperm.xlu0 %248, %v110_v12  }
  0x17   :  { %229 = vmatmul.msk.f32.gmra.mxu0 %vm59_vm0, %v31_v13 }
  0x1b   :  { %183 = vperm.xlu2 %250, %v180_v28  }
  0x65   :  { %v131_v37 = vpop.permute.xlu2 %130 }
  0x6d   :  { %v126_v39 = vpop.permute.xlu2 %125 }
  0x75   :  { %v184_v54 = vpop.permute.xlu2 %183 }
  0x76   :  { %v186_v55 = vperm.slane %v184_v54, 0 }
  0x77   :  { %v47_v19 = vpop.permute.xlu1 %46 }
  0x78   :  { %v57_v15 = vpop.permute.xlu0 %56 }
  0x7f   :  { %v42_v23 = vpop.permute.xlu1 %41 }
  0x80   :  { %v52_v24 = vpop.permute.xlu0 %51 }
  0x84   :  { %v89_v14 = vpop.f32.mrf.mxu0 }
  0x85   :  { %v90_v29 = vadd.f32 %v89_v14, %v42_v23 }
  0x87   :  { %v98_v16 = vpop.f32.mrf.mxu1  ;;  %v101_v32 = vmax.f32 %v90_v29, 0.0  ;;  %v116_v48 = vpop.permute.xlu1 %115 }
  0x88   :  { %v99_v18 = vadd.f32 %v98_v16, %v57_v15  ;;  %v121_v44 = vpop.permute.xlu0 %120 }
  0x8a   :  { %v104_v20 = vmax.f32 %v99_v18, 0.0 }
  0x8c   :  { %v92_v21 = vpop.f32.mrf.mxu0  ;;  %158 = vmatpush.msrb.mxu1 %v104_v20  ;;  %238 = vmatpush.msra.mxu2 %v104_v20 }
  0x8d   :  { %239 = vmatpush.msra.mxu3 %v104_v20  ;;  %v93_v26 = vadd.f32 %v92_v21, %v47_v19 }
  0x8f   :  { %v102_v31 = vmax.f32 %v93_v26, 0.0 }
  0x94   :  { %v95_v25 = vpop.f32.mrf.mxu0 }
  0x95   :  { %v96_v27 = vadd.f32 %v95_v25, %v52_v24 }
  0x97   :  { %v103_v30 = vmax.f32 %v96_v27, 0.0 }
  0x99   :  { %159 = vmatpush.msrb.mxu1 %v103_v30  ;;  %240 = vmatpush.msra.mxu2 %v103_v30 }
  0x9a   :  { %241 = vmatpush.msra.mxu3 %v103_v30 }
  0x9b   :  { %160 = vmatpush.msrb.mxu1 %v102_v31  ;;  %242 = vmatpush.msra.mxu2 %v102_v31 }
  0x9c   :  { %243 = vmatpush.msra.mxu3 %v102_v31 }
  0x9d   :  { %161 = vmatpush.msrb.mxu1 %v101_v32  ;;  %244 = vmatpush.msra.mxu2 %v101_v32 }
  0x9e   :  { %245 = vmatpush.msra.mxu3 %v101_v32  ;;  %231 = vmatmul.msk.f32.vlgmr.msrb.gmra.mxu1 %vm133_vm1, %v105_v33 }
  0x9f   :  { %232 = vmatmul.msk.f32.vlgmr.msra.gmra.mxu2 %vm133_vm1, %v106_v34  ;;  %233 = vmatmul.msk.f32.vlgmr.msra.gmra.mxu3 %vm133_vm1, %v107_v35 }
  0xa7   :  { %234 = vmatmul.msk.f32.gmra.mxu3 %vm133_vm1, %v108_v36 }
 0x11b   :  { %v163_v45 = vpop.f32.mrf.mxu1 }
 0x11c   :  { %v164_v49 = vadd.f32 %v163_v45, %v116_v48 }
 0x11e   :  { %v175_v52 = vmax.f32 %v164_v49, 0.0 }
 0x122   :  { %v169_v38 = vpop.f32.mrf.mxu3  ;;  %v166_v40 = vpop.f32.mrf.mxu2 }
 0x123   :  { %v170_v42 = vadd.f32 %v169_v38, %v126_v39  ;;  %v167_v46 = vadd.f32 %v166_v40, %v121_v44 }
 0x125   :  { %v177_v50 = vmax.f32 %v170_v42, 0.0  ;;  %v176_v51 = vmax.f32 %v167_v46, 0.0 }
 0x12a   :  { %v172_v41 = vpop.f32.mrf.mxu3 }
 0x12b   :  { %v173_v43 = vadd.f32 %v172_v41, %v131_v37 }
 0x12d   :  { %v178_v47 = vmax.f32 %v173_v43, 0.0 }
 0x12f   :  { %202 = vmatpush.msrb.mxu2 %v178_v47 }
 0x131   :  { %203 = vmatpush.msrb.mxu2 %v177_v50 }
 0x133   :  { %204 = vmatpush.msrb.mxu2 %v176_v51 }
 0x135   :  { %205 = vmatpush.msrb.mxu2 %v175_v52 }
 0x136   :  { %235 = vmatmul.msk.f32.vlgmr.msrb.gmra.mxu2 %vm133_vm1, %v179_v53 }
 0x1b9   :  { %v207_v56 = vpop.f32.mrf.mxu2 }
 0x1ba   :  { %v208_v57 = vadd.f32 %v207_v56, %v186_v55 }
 0x1bc   :  { %210 = vst [vmem:[#allocation3] sm:$0x1] %v208_v57 }
 0x1bd   :  { %221 = dma.vmem_to_hbm [thread:$0]  %s217_s0, 16, %s219_s14, [#allocation4]  }
 0x1be   :  { %275 = dma.done.wait [#allocation4], 16  }
 0x1bf   :  { %276 = vsyncadd [#allocation4], 4294967280 }
 0x1c0   :  { %226 = vsyncpa [#allocation4], 1 }

</bundles_post_ra>
